<compile_context>
chip_gen: v7x
topology: tpu7x:2x2x1
jax: 0.10.0
libtpu: 0.0.40
codegen_flags: <defaults>
</compile_context>

<pallas_src>
import math

import jax
import jax.numpy as jnp
from jax.experimental import pallas as pl
from jax.experimental.pallas import tpu as pltpu


def _two_mlp_head_kernel(x_ref, w6_ref, b6_ref, w7_ref, b7_ref, o_ref):
    # Cast the x tile to the MXU compute dtype in-kernel (avoids a separate
    # wrapper-side HBM pass over x; the VPU cast hides under the MXU).
    x = x_ref[...].astype(w6_ref.dtype)
    # fc6: bf16 MXU matmul, f32 accumulation; bias + ReLU in f32.
    h = jnp.dot(x, w6_ref[...], preferred_element_type=jnp.float32)
    h = jnp.maximum(h + b6_ref[...], 0.0)
    # fc7: same recipe.
    h = jnp.dot(h.astype(w7_ref.dtype), w7_ref[...],
                preferred_element_type=jnp.float32)
    h = jnp.maximum(h + b7_ref[...], 0.0)
    o_ref[...] = h.astype(o_ref.dtype)


def prepare_params(w6, b6, w7, b7, compute_dtype=jnp.bfloat16):
    """One-time parameter prep (do at model init, not per forward call).

    w6: [rep, in]  (PyTorch Linear layout) -> [in, rep] in compute_dtype
    w7: [rep, rep]                         -> [rep, rep] in compute_dtype
    b6, b7: [rep]                          -> [1, rep] in f32 (added post-acc)
    """
    rep = w6.shape[0]
    return (jnp.transpose(w6).astype(compute_dtype),
            b6.reshape(1, rep).astype(jnp.float32),
            jnp.transpose(w7).astype(compute_dtype),
            b7.reshape(1, rep).astype(jnp.float32))


def _round_up(x, m):
    return ((x + m - 1) // m) * m


def _device_kind():
    try:
        return jax.devices()[0].device_kind.lower()
    except Exception:
        return ""


def _vmem_capacity_bytes(kind):
    """Physical VMEM per TensorCore (generation-aware, with safe fallback)."""
    try:
        return int(pltpu.get_tpu_info().vmem_capacity_bytes)
    except Exception:
        # v7x: 64 MiB per TensorCore; v5e/v6e: 128 MiB.
        return (64 << 20) if "v7" in kind else (128 << 20)


def _resident_spec(block_shape, single_buffered):
    """Grid-invariant spec (constant index_map); single-buffered if supported."""
    idx = lambda i: (0,) * len(block_shape)
    if single_buffered and hasattr(pl, "Buffered"):
        try:
            return pl.BlockSpec(block_shape, idx, pipeline_mode=pl.Buffered(1))
        except TypeError:
            pass
    return pl.BlockSpec(block_shape, idx)


def two_mlp_head(x_nchw, params, *, block_m=None, out_dtype=jnp.float32):
    """
    x_nchw : [N, C, H, W] (any float dtype; cast to bf16 happens in-kernel)
    params : output of prepare_params() -> (w6_t, b6_2d, w7_t, b7_2d)
    returns: [N, rep] in out_dtype (pass jnp.bfloat16 if downstream accepts it
             to halve output HBM writeback)
    """
    w6_t, b6_2d, w7_t, b7_2d = params
    compute_dtype = w6_t.dtype

    n = x_nchw.shape[0]
    d_in = math.prod(x_nchw.shape[1:])
    rep = w6_t.shape[1]
    assert w6_t.shape[0] == d_in, "weight / input feature size mismatch"

    kind = _device_kind()
    two_tc = "v7" in kind
    if block_m is None:
        # v5e MXU is 4x128x128 -> tm=128 loses nothing; v6e/v7x are 2x256x256.
        block_m = 128 if "v5" in kind else 256

    # Flatten only; NO dtype cast here (cast happens inside the kernel).
    x2d = x_nchw.reshape(n, d_in)

    # Row tile: 16-row aligned (bf16 sublane packing), never larger than the
    # aligned batch. On 2-TensorCore parts, split into >= 2 tiles whenever N
    # allows so the "parallel" grid axis can shard across both TCs.
    row_align = 16
    tm = min(block_m, _round_up(n, row_align))
    if two_tc and n > row_align and _round_up(n, tm) // tm < 2:
        tm = _round_up((n + 1) // 2, row_align)
    n_pad = _round_up(n, tm)
    if n_pad != n:
        x2d = jnp.pad(x2d, ((0, n_pad - n), (0, 0)))
    grid_m = n_pad // tm

    x_bytes = jnp.dtype(x2d.dtype).itemsize
    comp_bytes = jnp.dtype(compute_dtype).itemsize
    out_bytes = jnp.dtype(out_dtype).itemsize
    weight_bytes = (d_in * rep + rep * rep) * comp_bytes + 2 * rep * 4

    cost = pl.CostEstimate(
        flops=2 * n_pad * (d_in * rep + rep * rep),
        transcendentals=0,
        bytes_accessed=n_pad * (d_in * x_bytes + rep * out_bytes) + weight_bytes,
    )

    def build_and_run(single_buffered_weights):
        # Explicit scoped-VMEM budget: resident weights/biases (x1 if
        # single-buffered, x2 otherwise) + double-buffered streaming x / out
        # tiles + compiler headroom, capped by this generation's VMEM.
        weight_bufs = 1 if single_buffered_weights else 2
        needed = (weight_bufs * weight_bytes
                  + 2 * tm * d_in * x_bytes
                  + 2 * tm * rep * out_bytes
                  + (4 << 20))
        cap = _vmem_capacity_bytes(kind) - (2 << 20)
        vmem_limit = int(min(max(needed, 32 << 20), cap))

        return pl.pallas_call(
            _two_mlp_head_kernel,
            out_shape=jax.ShapeDtypeStruct((n_pad, rep), out_dtype),
            grid_spec=pltpu.PrefetchScalarGridSpec(
                num_scalar_prefetch=0,
                grid=(grid_m,),
                in_specs=[
                    # Streaming x row-tile (input dtype; cast in-kernel).
                    pl.BlockSpec((tm, d_in), lambda i: (i, 0)),
                    # Grid-invariant weights / biases: VMEM-resident across
                    # all row tiles; single-buffered when supported.
                    _resident_spec((d_in, rep), single_buffered_weights),  # w6
                    _resident_spec((1, rep), single_buffered_weights),     # b6
                    _resident_spec((rep, rep), single_buffered_weights),   # w7
                    _resident_spec((1, rep), single_buffered_weights),     # b7
                ],
                out_specs=pl.BlockSpec((tm, rep), lambda i: (i, 0)),
            ),
            compiler_params=pltpu.CompilerParams(
                dimension_semantics=("parallel",),   # row tiles independent
                vmem_limit_bytes=vmem_limit,
            ),
            cost_estimate=cost,
        )(x2d, w6_t, b6_2d, w7_t, b7_2d)

    try:
        out = build_and_run(True)
    except Exception:
        # Fallback if this JAX/Mosaic build rejects single-buffered
        # (pipeline_mode=pl.Buffered(1)) grid-invariant inputs: use the
        # default double-buffered specs (costs VMEM, stays correct).
        out = build_and_run(False)

    return out[:n] if n_pad != n else out


def _reference(x_nchw, w6, b6, w7, b7, compute_dtype=jnp.bfloat16):
    """Pure-JAX reference with the same bf16-input / f32-accumulate recipe."""
    n = x_nchw.shape[0]
    x = x_nchw.reshape(n, -1).astype(compute_dtype)
    h = jnp.dot(x, jnp.transpose(w6).astype(compute_dtype),
                preferred_element_type=jnp.float32)
    h = jnp.maximum(h + b6[None, :], 0.0)
    h = jnp.dot(h.astype(compute_dtype), jnp.transpose(w7).astype(compute_dtype),
                preferred_element_type=jnp.float32)
    h = jnp.maximum(h + b7[None, :], 0.0)
    return h


if __name__ == "__main__":
    # Small, TPU-friendly shapes consistent with the module:
    #   N (rois) = 40, C = 4, H = W = 8  -> in_channels = C*H*W = 256
    #   representation_size = 128
    # block_m=16 forces a multi-step row grid (3 steps) plus row padding so
    # the tiled/pipelined path is exercised even at demo size.
    N, C, H, W = 40, 4, 8, 8
    in_channels = C * H * W
    representation_size = 128

    key = jax.random.PRNGKey(0)
    kx, k6w, k6b, k7w, k7b = jax.random.split(key, 5)

    x = jax.random.normal(kx, (N, C, H, W), dtype=jnp.float32)
    # Deterministic synthetic parameters (PyTorch Linear shapes: [out, in]).
    w6 = jax.random.normal(k6w, (representation_size, in_channels),
                           dtype=jnp.float32) * 0.02
    b6 = jax.random.normal(k6b, (representation_size,), dtype=jnp.float32) * 0.01
    w7 = jax.random.normal(k7w, (representation_size, representation_size),
                           dtype=jnp.float32) * 0.02
    b7 = jax.random.normal(k7b, (representation_size,), dtype=jnp.float32) * 0.01

    # One-time prep (transpose + bf16 cast) off the per-call hot path.
    params = prepare_params(w6, b6, w7, b7)

    out = two_mlp_head(x, params, block_m=16)
    out = jax.block_until_ready(out)

    ref = _reference(x, w6, b6, w7, b7)
    assert out.shape == (N, representation_size)
    assert jnp.allclose(out, ref, atol=1e-2, rtol=1e-2), "mismatch vs reference"

    print("KERNEL_OK")
</pallas_src>

<mosaic_0001>
module attributes {stable_mosaic.version = 11 : i64} {
  func.func @_two_mlp_head_kernel(%arg0: i32, %arg1: memref<16x256xf32, #tpu.memory_space<vmem>>, %arg2: memref<256x128xbf16, #tpu.memory_space<vmem>>, %arg3: memref<1x128xf32, #tpu.memory_space<vmem>>, %arg4: memref<128x128xbf16, #tpu.memory_space<vmem>>, %arg5: memref<1x128xf32, #tpu.memory_space<vmem>>, %arg6: memref<16x128xf32, #tpu.memory_space<vmem>>) attributes {dimension_semantics = [#tpu.dimension_semantics<parallel>], iteration_bounds = array<i64: 3>, scalar_prefetch = 0 : i64, scratch_operands = 0 : i64, tpu.core_type = #tpu.core_type<tc>, window_params = [{transform_indices = @transform_0, window_bounds = array<i64: 16, 256>}, {pipeline_mode = #tpu.pipeline_mode<synchronous>, transform_indices = @transform_1, window_bounds = array<i64: 256, 128>}, {pipeline_mode = #tpu.pipeline_mode<synchronous>, transform_indices = @transform_2, window_bounds = array<i64: 1, 128>}, {pipeline_mode = #tpu.pipeline_mode<synchronous>, transform_indices = @transform_3, window_bounds = array<i64: 128, 128>}, {pipeline_mode = #tpu.pipeline_mode<synchronous>, transform_indices = @transform_4, window_bounds = array<i64: 1, 128>}, {transform_indices = @transform_5, window_bounds = array<i64: 16, 128>}]} {
    %c0 = arith.constant 0 : index
    %c0_0 = arith.constant 0 : index
    %0 = vector.load %arg1[%c0, %c0_0] : memref<16x256xf32, #tpu.memory_space<vmem>>, vector<16x256xf32>
    %1 = arith.truncf %0 : vector<16x256xf32> to vector<16x256xbf16>
    %c0_1 = arith.constant 0 : index
    %c0_2 = arith.constant 0 : index
    %2 = vector.load %arg2[%c0_1, %c0_2] : memref<256x128xbf16, #tpu.memory_space<vmem>>, vector<256x128xbf16>
    %cst = arith.constant dense<0.000000e+00> : vector<16x128xf32>
    %3 = tpu.matmul %1, %2, %cst {dimension_numbers = #tpu.dot_dimension_numbers<[1], [0], [0], [1], [0, 0, 1, 1], [], []>} : vector<16x256xbf16>, vector<256x128xbf16>, vector<16x128xf32> -> vector<16x128xf32>
    %c0_3 = arith.constant 0 : index
    %c0_4 = arith.constant 0 : index
    %4 = vector.load %arg3[%c0_3, %c0_4] : memref<1x128xf32, #tpu.memory_space<vmem>>, vector<1x128xf32>
    %5 = vector.broadcast %4 : vector<1x128xf32> to vector<16x128xf32>
    %6 = arith.addf %3, %5 : vector<16x128xf32>
    %cst_5 = arith.constant 0.000000e+00 : f32
    %7 = vector.broadcast %cst_5 : f32 to vector<16x128xf32>
    %8 = arith.maximumf %6, %7 : vector<16x128xf32>
    %9 = arith.truncf %8 : vector<16x128xf32> to vector<16x128xbf16>
    %c0_6 = arith.constant 0 : index
    %c0_7 = arith.constant 0 : index
    %10 = vector.load %arg4[%c0_6, %c0_7] : memref<128x128xbf16, #tpu.memory_space<vmem>>, vector<128x128xbf16>
    %cst_8 = arith.constant dense<0.000000e+00> : vector<16x128xf32>
    %11 = tpu.matmul %9, %10, %cst_8 {dimension_numbers = #tpu.dot_dimension_numbers<[1], [0], [0], [1], [0, 0, 1, 1], [], []>} : vector<16x128xbf16>, vector<128x128xbf16>, vector<16x128xf32> -> vector<16x128xf32>
    %c0_9 = arith.constant 0 : index
    %c0_10 = arith.constant 0 : index
    %12 = vector.load %arg5[%c0_9, %c0_10] : memref<1x128xf32, #tpu.memory_space<vmem>>, vector<1x128xf32>
    %13 = vector.broadcast %12 : vector<1x128xf32> to vector<16x128xf32>
    %14 = arith.addf %11, %13 : vector<16x128xf32>
    %cst_11 = arith.constant 0.000000e+00 : f32
    %15 = vector.broadcast %cst_11 : f32 to vector<16x128xf32>
    %16 = arith.maximumf %14, %15 : vector<16x128xf32>
    %c0_12 = arith.constant 0 : index
    %c0_13 = arith.constant 0 : index
    %17 = vector.load %arg6[%c0_12, %c0_13] : memref<16x128xf32, #tpu.memory_space<vmem>>, vector<16x128xf32>
    tpu.vector_store %arg6[%c0_12, %c0_13], %16 {strides = array<i32>} : memref<16x128xf32, #tpu.memory_space<vmem>>, vector<16x128xf32>,
    return
  }
  func.func @transform_0(%arg0: i32) -> (i32, i32) {
    %c0_i32 = arith.constant 0 : i32
    %c0_i32_0 = arith.constant 0 : i32
    return %arg0, %c0_i32 : i32, i32
  }
  func.func @transform_1(%arg0: i32) -> (i32, i32) {
    %c0_i32 = arith.constant 0 : i32
    %c0_i32_0 = arith.constant 0 : i32
    %c0_i32_1 = arith.constant 0 : i32
    return %c0_i32, %c0_i32_0 : i32, i32
  }
  func.func @transform_2(%arg0: i32) -> (i32, i32) {
    %c0_i32 = arith.constant 0 : i32
    %c0_i32_0 = arith.constant 0 : i32
    %c0_i32_1 = arith.constant 0 : i32
    return %c0_i32, %c0_i32_0 : i32, i32
  }
  func.func @transform_3(%arg0: i32) -> (i32, i32) {
    %c0_i32 = arith.constant 0 : i32
    %c0_i32_0 = arith.constant 0 : i32
    %c0_i32_1 = arith.constant 0 : i32
    return %c0_i32, %c0_i32_0 : i32, i32
  }
  func.func @transform_4(%arg0: i32) -> (i32, i32) {
    %c0_i32 = arith.constant 0 : i32
    %c0_i32_0 = arith.constant 0 : i32
    %c0_i32_1 = arith.constant 0 : i32
    return %c0_i32, %c0_i32_0 : i32, i32
  }
  func.func @transform_5(%arg0: i32) -> (i32, i32) {
    %c0_i32 = arith.constant 0 : i32
    %c0_i32_0 = arith.constant 0 : i32
    return %arg0, %c0_i32 : i32, i32
  }
}

module attributes {stable_mosaic.version = 11 : i64} {
  func.func @_two_mlp_head_kernel(%arg0: i32, %arg1: memref<16x256xf32, #tpu.memory_space<vmem>>, %arg2: memref<256x128xbf16, #tpu.memory_space<vmem>>, %arg3: memref<1x128xf32, #tpu.memory_space<vmem>>, %arg4: memref<128x128xbf16, #tpu.memory_space<vmem>>, %arg5: memref<1x128xf32, #tpu.memory_space<vmem>>, %arg6: memref<16x128xf32, #tpu.memory_space<vmem>>) attributes {dimension_semantics = [#tpu.dimension_semantics<parallel>], iteration_bounds = array<i64: 3>, scalar_prefetch = 0 : i64, scratch_operands = 0 : i64, tpu.core_type = #tpu.core_type<tc>, window_params = [{transform_indices = @transform_0, window_bounds = array<i64: 16, 256>}, {pipeline_mode = #tpu.pipeline_mode<synchronous>, transform_indices = @transform_1, window_bounds = array<i64: 256, 128>}, {pipeline_mode = #tpu.pipeline_mode<synchronous>, transform_indices = @transform_2, window_bounds = array<i64: 1, 128>}, {pipeline_mode = #tpu.pipeline_mode<synchronous>, transform_indices = @transform_3, window_bounds = array<i64: 128, 128>}, {pipeline_mode = #tpu.pipeline_mode<synchronous>, transform_indices = @transform_4, window_bounds = array<i64: 1, 128>}, {transform_indices = @transform_5, window_bounds = array<i64: 16, 128>}]} {
    %c0 = arith.constant 0 : index
    %c0_0 = arith.constant 0 : index
    %0 = vector.load %arg1[%c0, %c0_0] : memref<16x256xf32, #tpu.memory_space<vmem>>, vector<16x256xf32>
    %1 = arith.truncf %0 : vector<16x256xf32> to vector<16x256xbf16>
    %c0_1 = arith.constant 0 : index
    %c0_2 = arith.constant 0 : index
    %2 = vector.load %arg2[%c0_1, %c0_2] : memref<256x128xbf16, #tpu.memory_space<vmem>>, vector<256x128xbf16>
    %cst = arith.constant dense<0.000000e+00> : vector<16x128xf32>
    %3 = tpu.matmul %1, %2, %cst {dimension_numbers = #tpu.dot_dimension_numbers<[1], [0], [0], [1], [0, 0, 1, 1], [], []>} : vector<16x256xbf16>, vector<256x128xbf16>, vector<16x128xf32> -> vector<16x128xf32>
    %c0_3 = arith.constant 0 : index
    %c0_4 = arith.constant 0 : index
    %4 = vector.load %arg3[%c0_3, %c0_4] : memref<1x128xf32, #tpu.memory_space<vmem>>, vector<1x128xf32>
    %5 = vector.broadcast %4 : vector<1x128xf32> to vector<16x128xf32>
    %6 = arith.addf %3, %5 : vector<16x128xf32>
    %cst_5 = arith.constant 0.000000e+00 : f32
    %7 = vector.broadcast %cst_5 : f32 to vector<16x128xf32>
    %8 = arith.maximumf %6, %7 : vector<16x128xf32>
    %9 = arith.truncf %8 : vector<16x128xf32> to vector<16x128xbf16>
    %c0_6 = arith.constant 0 : index
    %c0_7 = arith.constant 0 : index
    %10 = vector.load %arg4[%c0_6, %c0_7] : memref<128x128xbf16, #tpu.memory_space<vmem>>, vector<128x128xbf16>
    %cst_8 = arith.constant dense<0.000000e+00> : vector<16x128xf32>
    %11 = tpu.matmul %9, %10, %cst_8 {dimension_numbers = #tpu.dot_dimension_numbers<[1], [0], [0], [1], [0, 0, 1, 1], [], []>} : vector<16x128xbf16>, vector<128x128xbf16>, vector<16x128xf32> -> vector<16x128xf32>
    %c0_9 = arith.constant 0 : index
    %c0_10 = arith.constant 0 : index
    %12 = vector.load %arg5[%c0_9, %c0_10] : memref<1x128xf32, #tpu.memory_space<vmem>>, vector<1x128xf32>
    %13 = vector.broadcast %12 : vector<1x128xf32> to vector<16x128xf32>
    %14 = arith.addf %11, %13 : vector<16x128xf32>
    %cst_11 = arith.constant 0.000000e+00 : f32
    %15 = vector.broadcast %cst_11 : f32 to vector<16x128xf32>
    %16 = arith.maximumf %14, %15 : vector<16x128xf32>
    %c0_12 = arith.constant 0 : index
    %c0_13 = arith.constant 0 : index
    %17 = vector.load %arg6[%c0_12, %c0_13] : memref<16x128xf32, #tpu.memory_space<vmem>>, vector<16x128xf32>
    tpu.vector_store %arg6[%c0_12, %c0_13], %16 {strides = array<i32>} : memref<16x128xf32, #tpu.memory_space<vmem>>, vector<16x128xf32>,
    return
  }
  func.func @transform_0(%arg0: i32) -> (i32, i32) {
    %c0_i32 = arith.constant 0 : i32
    %c0_i32_0 = arith.constant 0 : i32
    return %arg0, %c0_i32 : i32, i32
  }
  func.func @transform_1(%arg0: i32) -> (i32, i32) {
    %c0_i32 = arith.constant 0 : i32
    %c0_i32_0 = arith.constant 0 : i32
    %c0_i32_1 = arith.constant 0 : i32
    return %c0_i32, %c0_i32_0 : i32, i32
  }
  func.func @transform_2(%arg0: i32) -> (i32, i32) {
    %c0_i32 = arith.constant 0 : i32
    %c0_i32_0 = arith.constant 0 : i32
    %c0_i32_1 = arith.constant 0 : i32
    return %c0_i32, %c0_i32_0 : i32, i32
  }
  func.func @transform_3(%arg0: i32) -> (i32, i32) {
    %c0_i32 = arith.constant 0 : i32
    %c0_i32_0 = arith.constant 0 : i32
    %c0_i32_1 = arith.constant 0 : i32
    return %c0_i32, %c0_i32_0 : i32, i32
  }
  func.func @transform_4(%arg0: i32) -> (i32, i32) {
    %c0_i32 = arith.constant 0 : i32
    %c0_i32_0 = arith.constant 0 : i32
    %c0_i32_1 = arith.constant 0 : i32
    return %c0_i32, %c0_i32_0 : i32, i32
  }
  func.func @transform_5(%arg0: i32) -> (i32, i32) {
    %c0_i32 = arith.constant 0 : i32
    %c0_i32_0 = arith.constant 0 : i32
    return %arg0, %c0_i32 : i32, i32
  }
}

</mosaic_0001>

<bundles_post_ra>
// kernel: tpu_custom_call.1
= control target key start
LH: loop header
LB: loop body
LE: loop exit
PB: predicated region body
PF: predicated region fallthrough
CT: control target
= control target key end

     0   :  { %10 = vsyncpa [#allocation3], 0  ;;  %s1328_s0 = inlined_call_operand.hbm [shape: f32[48,256], index: 0, kind: input, shape index: {}]   ;;  %s1329_s1 = inlined_call_operand.hbm [shape: bf16[256,128], index: 1, kind: input, shape index: {}]   ;;  %s1330_s2 = inlined_call_operand.vmem [shape: f32[1,128], index: 2, kind: input, shape index: {}]   ;;  %s1331_s3 = inlined_call_operand.hbm [shape: bf16[128,128], index: 3, kind: input, shape index: {}]   ;;  %s1332_s4 = inlined_call_operand.vmem [shape: f32[1,128], index: 4, kind: input, shape index: {}]   ;;  %s1333_s5 = inlined_call_operand.hbm [shape: f32[48,128], index: 5, kind: output, shape index: {}]  }
   0x1   :  { %12 = vsyncpa [#allocation3 + $0x1], 0 }
   0x2   :  { %13 = vsyncpa [#allocation6], 0 }
   0x3   :  { %14 = vsyncpa [#allocation4], 0 }
   0x4   :  { %16 = vsyncpa [#allocation4 + $0x1], 0  ;;  %s1081_s18 = smov 0   ;;  %s1083_s19 = smov 0  }
   0x5   :  { %s1085_s20 = smov 0   ;;  %s1087_s21 = smov 0  }
   0x6 LB: > { %s1102_s22 = sadd.s32 4294967295, %s1037_s21   ;;  %s683_s23 = sadd.s32 4294967294, %s1037_s21   ;;  %s1037_s21 = sphi %s1087_s21, %s1352_s21   ;;  %s1033_s20 = sphi %s1085_s20, %s1351_s20   ;;  %s1029_s19 = sphi %s1083_s19, %s1350_s19   ;;  %s1025_s18 = sphi %s1081_s18, %s1349_s18  }
   0x7   : > { %p42_p0 = scmp.ne.s32.totalorder %s1029_s19, %s1025_s18  ;;  %p1334_p1 = scmp.eq.s32.totalorder %s1102_s22, 0 }
   0x8   : > { %p156_p3 = scmp.eq.s32.totalorder %s683_s23, 2  ;;  %p684_p5 = scmp.ge.s32.totalorder %s1037_s21, 1 }
   0x9   : > { %p1111_p4 = por %p1334_p1, %p42_p0  ;;  %p163_p7 = scmp.lt.s32.totalorder %s1037_s21, 4 }
   0xa   : > { %p1116_p6 = por %p156_p3, %p42_p0  ;;  %s1039_s27 = smov [#allocation5]  }
   0xb   : > { %s1337_s24 = scalar_select %p1111_p4, 1, 0 }
   0xc   : > { %s1338_s25 = scalar_select %p1116_p6, 1, 0 }
   0xd   : > { %p1121_p8 = pnand %p684_p5, %p163_p7  ;;  %s175_s28 = sshll.u32 %s1039_s27, 4  ;;  %s176_s28 = int_to_ptr.vmem [resolvable:$true] %s175_s28 }
   0xe   : > { %s1040_s30 = smov [#allocation7]   ;;  %s881_s9 = scalar_lea.hbm %s1329_s1, 2048 }
   0xf   : > { %s1339_s26 = scalar_select %p1121_p8, 1, 0 }
  0x10   : > { %p794_p9 = pneg %p1121_p8  ;;  %s191_s6 = sshll.u32 %s1040_s30, 4  ;;  %s1133_s6 = int_to_ptr.vmem [resolvable:$true] %s191_s6 }
  0x11   : > { %p882_p11 = scmp.ne.s32.totalorder %s1329_s1, %s881_s9  ;;  %p888_p3 = scmp.lt.u32.totalorder %s881_s9, %s1329_s1 }
  0x12   : > { %p1129_p10 = pnand %p794_p9, %p1334_p1 }
  0x14   : > { %p883_p12 = pneg %p1129_p10 }
  0x16   : > { %p884_p13 = pnand %p883_p12, %p882_p11 }
  0x18   : > { %p885_p0 = pneg %p884_p13 }
  0x1a   : > { %p890_p5 = pnand %p888_p3, %p885_p0 }
  0x1c   : > { %893 = shalt.err (!%p890_p5)
}
  0x1d   : > { %s894_s14 = scalar_lea.vmem %s176_s28, 2048  ;;  %p902_p2 = scmp.lt.s32.totalorder %s176_s28, %s176_s28 }
  0x1e   : > { %p895_p7 = scmp.ne.s32.totalorder %s176_s28, %s894_s14  ;;  %p903_p6 = scmp.lt.s32.totalorder %s894_s14, %s894_s14 }
  0x20   : > { %p897_p9 = pnand %p895_p7, %p883_p12  ;;  %p904_p4 = por %p903_p6, %p902_p2 }
  0x22   : > { %p898_p1 = pneg %p897_p9 }
  0x24   : > { %p905_p8 = pnand %p904_p4, %p898_p1 }
  0x26   : > { %908 = shalt.err (!%p905_p8)
}
  0x27   : > { %s1041_s15 = smov 64   ;;  %s1042_s16 = smov 4  }
  0x28   : > { %797 = dma.hbm_to_vmem [thread:$0]  (!%p1129_p10), %s1329_s1, 2048, %s176_s28, [#allocation6], %s1041_s15, %s1041_s15, %s1042_s16  }
  0x29   : > { %s909_s7 = scalar_lea.hbm %s1331_s3, 1024 }
  0x2a   : > { %p910_p11 = scmp.ne.s32.totalorder %s1331_s3, %s909_s7  ;;  %p916_p4 = scmp.lt.u32.totalorder %s909_s7, %s1331_s3 }
  0x2c   : > { %p912_p1 = pnand %p910_p11, %p883_p12 }
  0x2e   : > { %p913_p2 = pneg %p912_p1 }
  0x30   : > { %p918_p6 = pnand %p916_p4, %p913_p2 }
  0x32   : > { %921 = shalt.err (!%p918_p6)
}
  0x33   : > { %s922_s28 = scalar_lea.vmem %s1133_s6, 1024  ;;  %p930_p3 = scmp.lt.s32.totalorder %s1133_s6, %s1133_s6 }
  0x34   : > { %p923_p8 = scmp.ne.s32.totalorder %s1133_s6, %s922_s28  ;;  %p931_p5 = scmp.lt.s32.totalorder %s922_s28, %s922_s28 }
  0x36   : > { %p925_p13 = pnand %p923_p8, %p883_p12  ;;  %p932_p7 = por %p931_p5, %p930_p3 }
  0x38   : > { %p926_p0 = pneg %p925_p13 }
  0x3a   : > { %p933_p9 = pnand %p932_p7, %p926_p0 }
  0x3c   : > { %936 = shalt.err (!%p933_p9)
}
  0x3d   : > { %800 = dma.hbm_to_vmem [thread:$0]  (!%p1129_p10), %s1331_s3, 1024, %s1133_s6, [#allocation6], %s1041_s15, %s1041_s15, %s1042_s16  }
  0x3e   : > { %s1183_s14 = sadd.s32 1, %s1037_s21   ;;  %s29_s29 = sadd.s32 1, %s1033_s20 }
  0x3f   : > { %s26_s17 = ssub.s32 %s1037_s21, %s1183_s14  ;;  %p36_p12 = scmp.ne.s32.totalorder %s1033_s20, %s1029_s19 }
  0x40   : > { %p27_p11 = scmp.eq.s32.totalorder %s26_s17, 0  ;;  %p37_p1 = scmp.eq.s32.totalorder %s1037_s21, 0 }
  0x41   : > { %p1341_p2 = scmp.eq.s32.totalorder %s1102_s22, 2  ;;  %p811_p6 = scmp.lt.s32.totalorder %s1037_s21, 3 }
  0x42   : > { %s1199_s27 = scalar_select %p27_p11, %s1033_s20, %s29_s29  }
  0x43   : > { %p1193_p4 = por %p1341_p2, %p36_p12  ;;  %p38_p8 = por %p37_p1, %p36_p12 }
  0x44   : > { %s208_s30 = sand.u32 1, %s1033_s20   ;;  %s729_s6 = sshll.u32 %s1037_s21, 9 }
  0x45   : > { %s688_s7 = sshll.u32 %s208_s30, 5  ;;  %s1206_s8 = scalar_lea.hbm %s1328_s0, %s729_s6 }
  0x46   : > { %s212_s9 = scalar_lea.vmem [#allocation2], %s688_s7  ;;  %p1210_p10 = pnand %p811_p6, %p38_p8 }
  0x47   : > { %s220_s10 = sshll.u32 %s212_s9, 4  ;;  %s1214_s28 = scalar_lea.sflag [#allocation3], %s208_s30  ;;  %s1208_s10 = int_to_ptr.vmem [resolvable:$true] %s220_s10 }
  0x48   : > { %s937_s12 = scalar_lea.hbm %s1206_s8, 512  ;;  %p939_p0 = pneg %p1210_p10 }
  0x49   : > { %p938_p13 = scmp.ne.s32.totalorder %s1206_s8, %s937_s12  ;;  %s942_s17 = scalar_lea.hbm %s1328_s0, 1536 }
  0x4a   : > { %p943_p7 = scmp.lt.u32.totalorder %s1206_s8, %s1328_s0  ;;  %p944_p9 = scmp.lt.u32.totalorder %s942_s17, %s937_s12 }
  0x4b   : > { %p940_p3 = pnand %p939_p0, %p938_p13  ;;  %p946_p11 = scmp.lt.u32.totalorder %s937_s12, %s1206_s8 }
  0x4c   : > { %p945_p12 = por %p944_p9, %p943_p7 }
  0x4d   : > { %p941_p5 = pneg %p940_p3 }
  0x4e   : > { %p947_p1 = por %p946_p11, %p945_p12 }
  0x50   : > { %p948_p2 = pnand %p947_p1, %p941_p5 }
  0x52   : > { %951 = shalt.err (!%p948_p2)
}
  0x53   : > { %s952_s30 = scalar_lea.vmem %s1208_s10, 512  ;;  %s1043_s15 = smov [#allocation2]  }
  0x54   : > { %p953_p6 = scmp.ne.s32.totalorder %s1208_s10, %s952_s30  ;;  %s957_s16 = sshll.u32 %s1043_s15, 4  ;;  %s958_s16 = int_to_ptr.vmem [resolvable:$false] %s957_s16 }
  0x55   : > { %s959_s9 = scalar_lea.vmem %s958_s16, 1024  ;;  %p960_p3 = scmp.lt.s32.totalorder %s1208_s10, %s958_s16 }
  0x56   : > { %p955_p8 = pnand %p953_p6, %p939_p0  ;;  %p961_p7 = scmp.lt.s32.totalorder %s959_s9, %s952_s30 }
  0x58   : > { %p956_p13 = pneg %p955_p8  ;;  %p962_p9 = por %p961_p7, %p960_p3 }
  0x5a   : > { %p963_p12 = pnand %p962_p9, %p956_p13 }
  0x5c   : > { %966 = shalt.err (!%p963_p12)
}
  0x5d   : > { %s1044_s12 = smov 256   ;;  %s1045_s13 = smov 16  }
  0x5e   : > { %804 = dma.hbm_to_vmem [thread:$0]  (!%p1210_p10), %s1206_s8, 512, %s1208_s10, %s1214_s28, %s1044_s12, %s1044_s12, %s1045_s13  }
  0x5f   : > { %p1344_p0 = scmp.ne.s32.totalorder %s1339_s26, 0 }
  0x60   : > { %s1245_s29 = sand.u32 (!%p1344_p0), 1, %s1029_s19   ;;  %p1345_p5 = scmp.ne.s32.totalorder (!%p1344_p0), %s1337_s24, 0 }
  0x61   : > { %232 = sbr.rel (%p1344_p0) target bundleno = 597 (0x255), region = 40  ;;  %s693_s17 = sshll.u32 (!%p1344_p0), %s1245_s29, 5 }
  0x62   : > { %s235_s7 = scalar_lea.sflag (!%p1344_p0), [#allocation3], %s1245_s29  ;;  %s1249_s6 = scalar_lea.vmem (!%p1344_p0), [#allocation2], %s693_s17 }
  0x68   : > { %1012 = dma.done.wait (%p1345_p5), %s235_s7, 512  }
  0x69   : > { %1014 = vsyncadd (%p1345_p5), %s235_s7, 4294966784  ;;  %p1346_p10 = scmp.eq.s32.totalorder %s1102_s22, 0 }
  0x6b   : > { %1016 = dma.done.wait (%p1346_p10), [#allocation6], 3072   ;;  %p1347_p11 = pmov %p1346_p10 }
  0x6c   : > { %v1046_v0 = vmov 0.0   ;;  %v857_v1 = vld [vmem:[#allocation5 + $0x40] sm:$0xff]   ;;  %v859_v3 = vld [vmem:[#allocation5 + $0x48] sm:$0xff]   ;;  %v861_v5 = vld [vmem:[#allocation5 + $0x50] sm:$0xff]   ;;  %vm1047_vm0 = vmmov 0   ;;  %s696_s8 = sshll.u32 %s1245_s29, 4 }
  0x6d   : > { %1018 = vsyncadd (%p1347_p11), [#allocation6], 4294964224  ;;  %762 = vmatprep.subr.bf16.mxu1 %v1046_v0  ;;  %v858_v2 = vld [vmem:[#allocation5] sm:$0xff]   ;;  %731 = vmatprep.subr.bf16.mxu0 %v857_v1  ;;  %v860_v4 = vld [vmem:[#allocation5 + $0x8] sm:$0xff]   ;;  %s272_s28 = scalar_lea.vmem [#allocation8], %s696_s8  ;;  %s730_s15 = sshll.u32 %s1102_s22, 8 }
  0x6e   : > { %732 = vmatpush3.bf16.msra.mxu0 %v858_v2  ;;  %v862_v6 = vld [vmem:[#allocation5 + $0x10] sm:$0xff]   ;;  %v863_v7 = vld [vmem:[#allocation5 + $0x58] sm:$0xff]   ;;  %v865_v9 = vld [vmem:[#allocation5 + $0x60] sm:$0xff]   ;;  %778 = vmatprep.mubr.msk.bf16.mxu1 %vm1047_vm0, %v1046_v0  ;;  %s591_s30 = sshll.u32 %s272_s28, 4  ;;  %s1285_s12 = scalar_lea.hbm %s1333_s5, %s730_s15  ;;  %s1280_s30 = int_to_ptr.vmem [resolvable:$true] %s591_s30 }
  0x6f   : > { %733 = vmatprep.subr.bf16.mxu0 %v859_v3  ;;  %v864_v8 = vld [vmem:[#allocation5 + $0x18] sm:$0xff]   ;;  %v866_v10 = vld [vmem:[#allocation5 + $0x20] sm:$0xff]   ;;  %v867_v11 = vld [vmem:[#allocation5 + $0x68] sm:$0xff]   ;;  %s578_s13 = scalar_lea.sflag [#allocation4], %s1245_s29  ;;  %s967_s17 = scalar_lea.vmem %s1280_s30, 256 }
  0x70   : > { %v277_v12 = vld [vmem:[%s1249_s6 + $0x8] sm:$0xff]  ;;  %v279_v13 = vld [vmem:[%s1249_s6 + $0x18] sm:$0xff]  ;;  %v873_v16 = vld [vmem:[#allocation7] sm:$0xff]   ;;  %p968_p1 = scmp.ne.s32.totalorder %s1280_s30, %s967_s17  ;;  %s1048_s22 = smov [#allocation8]  }
  0x71   : > { %v868_v14 = vld [vmem:[#allocation5 + $0x28] sm:$0xff]   ;;  %v281_v15 = vpack.c.bf16 %v279_v13, %v277_v12  ;;  %v869_v17 = vld [vmem:[#allocation5 + $0x70] sm:$0xff]   ;;  %763 = vmatpush3.bf16.msra.mxu1 %v873_v16  ;;  %v871_v20 = vld [vmem:[#allocation5 + $0x78] sm:$0xff]   ;;  %s971_s7 = sshll.u32 %s1048_s22, 4  ;;  %s972_s7 = int_to_ptr.vmem [resolvable:$false] %s971_s7 }
  0x72   : > { %734 = vmatpush3.bf16.msra.mxu0 %v860_v4  ;;  %v874_v18 = vld [vmem:[#allocation7 + $0x8] sm:$0xff]   ;;  %764 = vmatprep.subr.bf16.mxu1 %v1046_v0  ;;  %v870_v19 = vld [vmem:[#allocation5 + $0x30] sm:$0xff]   ;;  %v872_v22 = vld [vmem:[#allocation5 + $0x38] sm:$0xff]   ;;  %p969_p2 = pnand %p968_p1, %p1193_p4  ;;  %p974_p8 = scmp.lt.s32.totalorder %s1280_s30, %s972_s7 }
  0x73   : > { %735 = vmatprep.subr.bf16.mxu0 %v861_v5  ;;  %449 = vmatprep.mubr.bf16.mxu0 %v281_v15  ;;  %v875_v21 = vld [vmem:[#allocation7 + $0x10] sm:$0xff]   ;;  %v276_v23 = vld [vmem:[%s1249_s6] sm:$0xff]  ;;  %v876_v25 = vld [vmem:[#allocation7 + $0x18] sm:$0xff]  }
  0x74   : > { %v278_v24 = vld [vmem:[%s1249_s6 + $0x10] sm:$0xff]  ;;  %v877_v27 = vld [vmem:[#allocation7 + $0x20] sm:$0xff]   ;;  %v878_v28 = vld [vmem:[#allocation7 + $0x28] sm:$0xff]   ;;  %p970_p6 = pneg %p969_p2  ;;  %s973_s6 = scalar_lea.vmem %s972_s7, 512 }
  0x75   : > { %765 = vmatpush3.bf16.msra.mxu1 %v874_v18  ;;  %v280_v26 = vpack.c.bf16 %v278_v24, %v276_v23  ;;  %v879_v29 = vld [vmem:[#allocation7 + $0x30] sm:$0xff]   ;;  %v880_v30 = vld [vmem:[#allocation7 + $0x38] sm:$0xff]   ;;  %v697_v32 = vld [vmem:[%s1330_s2] ss:$0 sm:$0xff]  ;;  %p975_p13 = scmp.lt.s32.totalorder %s973_s6, %s967_s17 }
  0x76   : > { %736 = vmatpush3.bf16.msra.mxu0 %v862_v6  ;;  %766 = vmatprep.subr.bf16.mxu1 %v1046_v0  ;;  %v714_v43 = vld [vmem:[%s1332_s4] ss:$0 sm:$0xff] }
  0x77   : > { %737 = vmatprep.subr.bf16.mxu0 %v863_v7  ;;  %p976_p3 = por %p975_p13, %p974_p8 }
  0x79   : > { %767 = vmatpush3.bf16.msra.mxu1 %v875_v21  ;;  %p977_p7 = pnand %p976_p3, %p970_p6 }
  0x7a   : > { %738 = vmatpush3.bf16.msra.mxu0 %v864_v8  ;;  %768 = vmatprep.subr.bf16.mxu1 %v1046_v0 }
  0x7b   : > { %739 = vmatprep.subr.bf16.mxu0 %v865_v9 }
  0x7d   : > { %769 = vmatpush3.bf16.msra.mxu1 %v876_v25 }
  0x7e   : > { %740 = vmatpush3.bf16.msra.mxu0 %v866_v10  ;;  %770 = vmatprep.subr.bf16.mxu1 %v1046_v0 }
  0x7f   : > { %741 = vmatprep.subr.bf16.mxu0 %v867_v11 }
  0x81   : > { %771 = vmatpush3.bf16.msra.mxu1 %v877_v27 }
  0x82   : > { %742 = vmatpush3.bf16.msra.mxu0 %v868_v14  ;;  %772 = vmatprep.subr.bf16.mxu1 %v1046_v0 }
  0x83   : > { %743 = vmatprep.subr.bf16.mxu0 %v869_v17 }
  0x85   : > { %773 = vmatpush3.bf16.msra.mxu1 %v878_v28 }
  0x86   : > { %744 = vmatpush3.bf16.msra.mxu0 %v870_v19  ;;  %774 = vmatprep.subr.bf16.mxu1 %v1046_v0 }
  0x87   : > { %745 = vmatprep.subr.bf16.mxu0 %v871_v20 }
  0x89   : > { %775 = vmatpush3.bf16.msra.mxu1 %v879_v29 }
  0x8a   : > { %746 = vmatpush3.bf16.msra.mxu0 %v872_v22  ;;  %776 = vmatprep.subr.bf16.mxu1 %v1046_v0 }
  0x8d   : > { %450 = vmatmul.mubr.bf16.vlgmr.msra.gmra.mrb[0].mxu0 %v280_v26  ;;  %777 = vmatpush3.bf16.msra.mxu1 %v880_v30 }
 0x160   : > { %v747_v31 = vpop.f32.mrb[0].mxu0 }
 0x161   : > { %v748_v33 = vpop.f32.mrb[1].mxu0 }
 0x162   : > { %v749_v34 = vadd.f32 %v748_v33, %v747_v31  ;;  %v750_v35 = vpop.f32.mrb[2].mxu0 }
 0x163   : > { %v751_v36 = vpop.f32.mrb[3].mxu0 }
 0x164   : > { %v452_v37 = vadd.f32 %v749_v34, %v697_v32  ;;  %v752_v38 = vadd.f32 %v751_v36, %v750_v35 }
 0x166   : > { %v455_v39 = vadd.f32 %v752_v38, %v697_v32  ;;  %v458_v40 = vmax.f32 %v452_v37, 0.0 }
 0x168   : > { %v459_v41 = vmax.f32 %v455_v39, 0.0 }
 0x16a   : > { %v460_v42 = vpack.c.bf16 %v459_v41, %v458_v40 }
 0x16c   : > { %779 = vmatmul.mubr.bf16.vlgmr.msra.gmra.mrb[0].mxu1 %v460_v42 }
 0x23f   : > { %v566_v44 = vpop.f32.mrb[0].mxu1 }
 0x240   : > { %v567_v45 = vadd.f32 %v714_v43, %v566_v44  ;;  %v780_v46 = vpop.f32.mrb[1].mxu1 }
 0x241   : > { %v569_v47 = vpop.f32.mrb[2].mxu1 }
 0x242   : > { %v573_v48 = vmax.f32 %v567_v45, 0.0  ;;  %v570_v49 = vadd.f32 %v714_v43, %v569_v47  ;;  %v781_v50 = vpop.f32.mrb[3].mxu1 }
 0x244   : > { %575 = vst [vmem:[%s272_s28] sm:$0xff] %v573_v48  ;;  %v574_v51 = vmax.f32 %v570_v49, 0.0 }
 0x246   : > { %576 = vst [vmem:[%s272_s28 + $0x8] sm:$0xff] %v574_v51 }
 0x247   : > { %980 = shalt.err (!%p977_p7)
}
 0x248   : > { %s981_s24 = scalar_lea.hbm %s1285_s12, 256  ;;  %s985_s10 = scalar_lea.hbm %s1333_s5, 768 }
 0x249   : > { %p982_p9 = scmp.ne.s32.totalorder %s1285_s12, %s981_s24  ;;  %p986_p5 = scmp.lt.u32.totalorder %s1285_s12, %s1333_s5 }
 0x24a   : > { %p987_p10 = scmp.lt.u32.totalorder %s985_s10, %s981_s24  ;;  %p989_p1 = scmp.lt.u32.totalorder %s981_s24, %s1285_s12 }
 0x24b   : > { %p983_p12 = pnand %p982_p9, %p1193_p4 }
 0x24c   : > { %p988_p11 = por %p987_p10, %p986_p5 }
 0x24d   : > { %p984_p0 = pneg %p983_p12 }
 0x24e   : > { %p990_p2 = por %p989_p1, %p988_p11 }
 0x250   : > { %p991_p6 = pnand %p990_p2, %p984_p0 }
 0x252   : > { %994 = shalt.err (!%p991_p6)
}
 0x253   : > { %s1049_s15 = smov 128   ;;  %s1050_s16 = smov 8  }
 0x254   : > { %792 = dma.vmem_to_hbm [thread:$0]  (%p1193_p4), %s1280_s30, 256, %s1285_s12, %s578_s13, %s1049_s15, %s1049_s15, %s1050_s16  }
 0x255 PF: > { %p814_p8 = scmp.ge.s32.totalorder %s1037_s21, 2  ;;  %s606_s9 = sand.u32 1, %s1025_s18  }
 0x256   : > { %p1348_p13 = scmp.ne.s32.totalorder %s1338_s25, 0  ;;  %s607_s17 = scalar_lea.sflag [#allocation4], %s606_s9 }
 0x258   : > { %p806_p3 = pnand %p814_p8, %p1348_p13 }
 0x25a   : > { %1020 = dma.done.wait (!%p806_p3), %s607_s17, 256  }
 0x25b   : > { %1022 = vsyncadd (!%p806_p3), %s607_s17, 4294967040  ;;  %p19_p7 = scmp.ge.s32.totalorder %s1183_s14, 5   ;;  %s1349_s18 = smov %s1029_s19 }
 0x25c   : > { %s1350_s19 = smov %s1033_s20  ;;  %s1351_s20 = smov %s1199_s27 }
 0x25d   : > { %s1352_s21 = smov %s1183_s14  ;;  %21 = sbr.rel (!%p19_p7) target bundleno = 6 (0x6), region = 93 }
 0x264   :  { %612 = vsyncpa [#allocation3], 1 }
 0x265   :  { %614 = vsyncpa [#allocation3 + $0x1], 1 }
 0x266   :  { %615 = vsyncpa [#allocation6], 1 }
 0x267   :  { %616 = vsyncpa [#allocation4], 1 }
 0x268   :  { %618 = vsyncpa [#allocation4 + $0x1], 1 }

// kernel: tpu_custom_call.1
= control target key start
LH: loop header
LB: loop body
LE: loop exit
PB: predicated region body
PF: predicated region fallthrough
CT: control target
= control target key end

     0   :  { %10 = vsyncpa [#allocation3], 0  ;;  %s1328_s0 = inlined_call_operand.hbm [shape: f32[48,256], index: 0, kind: input, shape index: {}]   ;;  %s1329_s1 = inlined_call_operand.hbm [shape: bf16[256,128], index: 1, kind: input, shape index: {}]   ;;  %s1330_s2 = inlined_call_operand.vmem [shape: f32[1,128], index: 2, kind: input, shape index: {}]   ;;  %s1331_s3 = inlined_call_operand.hbm [shape: bf16[128,128], index: 3, kind: input, shape index: {}]   ;;  %s1332_s4 = inlined_call_operand.vmem [shape: f32[1,128], index: 4, kind: input, shape index: {}]   ;;  %s1333_s5 = inlined_call_operand.hbm [shape: f32[48,128], index: 5, kind: output, shape index: {}]  }
   0x1   :  { %12 = vsyncpa [#allocation3 + $0x1], 0 }
   0x2   :  { %13 = vsyncpa [#allocation6], 0 }
   0x3   :  { %14 = vsyncpa [#allocation4], 0 }
   0x4   :  { %16 = vsyncpa [#allocation4 + $0x1], 0  ;;  %s1081_s18 = smov 0   ;;  %s1083_s19 = smov 0  }
   0x5   :  { %s1085_s20 = smov 0   ;;  %s1087_s21 = smov 0  }
   0x6 LB: > { %s1102_s22 = sadd.s32 4294967295, %s1037_s21   ;;  %s683_s23 = sadd.s32 4294967294, %s1037_s21   ;;  %s1037_s21 = sphi %s1087_s21, %s1352_s21   ;;  %s1033_s20 = sphi %s1085_s20, %s1351_s20   ;;  %s1029_s19 = sphi %s1083_s19, %s1350_s19   ;;  %s1025_s18 = sphi %s1081_s18, %s1349_s18  }
   0x7   : > { %p42_p0 = scmp.ne.s32.totalorder %s1029_s19, %s1025_s18  ;;  %p1334_p1 = scmp.eq.s32.totalorder %s1102_s22, 0 }
   0x8   : > { %p156_p3 = scmp.eq.s32.totalorder %s683_s23, 2  ;;  %p684_p5 = scmp.ge.s32.totalorder %s1037_s21, 1 }
   0x9   : > { %p1111_p4 = por %p1334_p1, %p42_p0  ;;  %p163_p7 = scmp.lt.s32.totalorder %s1037_s21, 4 }
   0xa   : > { %p1116_p6 = por %p156_p3, %p42_p0  ;;  %s1039_s27 = smov [#allocation5]  }
   0xb   : > { %s1337_s24 = scalar_select %p1111_p4, 1, 0 }
   0xc   : > { %s1338_s25 = scalar_select %p1116_p6, 1, 0 }
   0xd   : > { %p1121_p8 = pnand %p684_p5, %p163_p7  ;;  %s175_s28 = sshll.u32 %s1039_s27, 4  ;;  %s176_s28 = int_to_ptr.vmem [resolvable:$true] %s175_s28 }
   0xe   : > { %s1040_s30 = smov [#allocation7]   ;;  %s881_s9 = scalar_lea.hbm %s1329_s1, 2048 }
   0xf   : > { %s1339_s26 = scalar_select %p1121_p8, 1, 0 }
  0x10   : > { %p794_p9 = pneg %p1121_p8  ;;  %s191_s6 = sshll.u32 %s1040_s30, 4  ;;  %s1133_s6 = int_to_ptr.vmem [resolvable:$true] %s191_s6 }
  0x11   : > { %p882_p11 = scmp.ne.s32.totalorder %s1329_s1, %s881_s9  ;;  %p888_p3 = scmp.lt.u32.totalorder %s881_s9, %s1329_s1 }
  0x12   : > { %p1129_p10 = pnand %p794_p9, %p1334_p1 }
  0x14   : > { %p883_p12 = pneg %p1129_p10 }
  0x16   : > { %p884_p13 = pnand %p883_p12, %p882_p11 }
  0x18   : > { %p885_p0 = pneg %p884_p13 }
  0x1a   : > { %p890_p5 = pnand %p888_p3, %p885_p0 }
  0x1c   : > { %893 = shalt.err (!%p890_p5)
}
  0x1d   : > { %s894_s14 = scalar_lea.vmem %s176_s28, 2048  ;;  %p902_p2 = scmp.lt.s32.totalorder %s176_s28, %s176_s28 }
  0x1e   : > { %p895_p7 = scmp.ne.s32.totalorder %s176_s28, %s894_s14  ;;  %p903_p6 = scmp.lt.s32.totalorder %s894_s14, %s894_s14 }
  0x20   : > { %p897_p9 = pnand %p895_p7, %p883_p12  ;;  %p904_p4 = por %p903_p6, %p902_p2 }
  0x22   : > { %p898_p1 = pneg %p897_p9 }
  0x24   : > { %p905_p8 = pnand %p904_p4, %p898_p1 }
  0x26   : > { %908 = shalt.err (!%p905_p8)
}
  0x27   : > { %s1041_s15 = smov 64   ;;  %s1042_s16 = smov 4  }
  0x28   : > { %797 = dma.hbm_to_vmem [thread:$0]  (!%p1129_p10), %s1329_s1, 2048, %s176_s28, [#allocation6], %s1041_s15, %s1041_s15, %s1042_s16  }
  0x29   : > { %s909_s7 = scalar_lea.hbm %s1331_s3, 1024 }
  0x2a   : > { %p910_p11 = scmp.ne.s32.totalorder %s1331_s3, %s909_s7  ;;  %p916_p4 = scmp.lt.u32.totalorder %s909_s7, %s1331_s3 }
  0x2c   : > { %p912_p1 = pnand %p910_p11, %p883_p12 }
  0x2e   : > { %p913_p2 = pneg %p912_p1 }
  0x30   : > { %p918_p6 = pnand %p916_p4, %p913_p2 }
  0x32   : > { %921 = shalt.err (!%p918_p6)
}
  0x33   : > { %s922_s28 = scalar_lea.vmem %s1133_s6, 1024  ;;  %p930_p3 = scmp.lt.s32.totalorder %s1133_s6, %s1133_s6 }
  0x34   : > { %p923_p8 = scmp.ne.s32.totalorder %s1133_s6, %s922_s28  ;;  %p931_p5 = scmp.lt.s32.totalorder %s922_s28, %s922_s28 }
  0x36   : > { %p925_p13 = pnand %p923_p8, %p883_p12  ;;  %p932_p7 = por %p931_p5, %p930_p3 }
  0x38   : > { %p926_p0 = pneg %p925_p13 }
  0x3a   : > { %p933_p9 = pnand %p932_p7, %p926_p0 }
  0x3c   : > { %936 = shalt.err (!%p933_p9)
}
  0x3d   : > { %800 = dma.hbm_to_vmem [thread:$0]  (!%p1129_p10), %s1331_s3, 1024, %s1133_s6, [#allocation6], %s1041_s15, %s1041_s15, %s1042_s16  }
  0x3e   : > { %s1183_s14 = sadd.s32 1, %s1037_s21   ;;  %s29_s29 = sadd.s32 1, %s1033_s20 }
  0x3f   : > { %s26_s17 = ssub.s32 %s1037_s21, %s1183_s14  ;;  %p36_p12 = scmp.ne.s32.totalorder %s1033_s20, %s1029_s19 }
  0x40   : > { %p27_p11 = scmp.eq.s32.totalorder %s26_s17, 0  ;;  %p37_p1 = scmp.eq.s32.totalorder %s1037_s21, 0 }
  0x41   : > { %p1341_p2 = scmp.eq.s32.totalorder %s1102_s22, 2  ;;  %p811_p6 = scmp.lt.s32.totalorder %s1037_s21, 3 }
  0x42   : > { %s1199_s27 = scalar_select %p27_p11, %s1033_s20, %s29_s29  }
  0x43   : > { %p1193_p4 = por %p1341_p2, %p36_p12  ;;  %p38_p8 = por %p37_p1, %p36_p12 }
  0x44   : > { %s208_s30 = sand.u32 1, %s1033_s20   ;;  %s729_s6 = sshll.u32 %s1037_s21, 9 }
  0x45   : > { %s688_s7 = sshll.u32 %s208_s30, 5  ;;  %s1206_s8 = scalar_lea.hbm %s1328_s0, %s729_s6 }
  0x46   : > { %s212_s9 = scalar_lea.vmem [#allocation2], %s688_s7  ;;  %p1210_p10 = pnand %p811_p6, %p38_p8 }
  0x47   : > { %s220_s10 = sshll.u32 %s212_s9, 4  ;;  %s1214_s28 = scalar_lea.sflag [#allocation3], %s208_s30  ;;  %s1208_s10 = int_to_ptr.vmem [resolvable:$true] %s220_s10 }
  0x48   : > { %s937_s12 = scalar_lea.hbm %s1206_s8, 512  ;;  %p939_p0 = pneg %p1210_p10 }
  0x49   : > { %p938_p13 = scmp.ne.s32.totalorder %s1206_s8, %s937_s12  ;;  %s942_s17 = scalar_lea.hbm %s1328_s0, 1536 }
  0x4a   : > { %p943_p7 = scmp.lt.u32.totalorder %s1206_s8, %s1328_s0  ;;  %p944_p9 = scmp.lt.u32.totalorder %s942_s17, %s937_s12 }
  0x4b   : > { %p940_p3 = pnand %p939_p0, %p938_p13  ;;  %p946_p11 = scmp.lt.u32.totalorder %s937_s12, %s1206_s8 }
  0x4c   : > { %p945_p12 = por %p944_p9, %p943_p7 }
  0x4d   : > { %p941_p5 = pneg %p940_p3 }
  0x4e   : > { %p947_p1 = por %p946_p11, %p945_p12 }
  0x50   : > { %p948_p2 = pnand %p947_p1, %p941_p5 }
  0x52   : > { %951 = shalt.err (!%p948_p2)
}
  0x53   : > { %s952_s30 = scalar_lea.vmem %s1208_s10, 512  ;;  %s1043_s15 = smov [#allocation2]  }
  0x54   : > { %p953_p6 = scmp.ne.s32.totalorder %s1208_s10, %s952_s30  ;;  %s957_s16 = sshll.u32 %s1043_s15, 4  ;;  %s958_s16 = int_to_ptr.vmem [resolvable:$false] %s957_s16 }
  0x55   : > { %s959_s9 = scalar_lea.vmem %s958_s16, 1024  ;;  %p960_p3 = scmp.lt.s32.totalorder %s1208_s10, %s958_s16 }
  0x56   : > { %p955_p8 = pnand %p953_p6, %p939_p0  ;;  %p961_p7 = scmp.lt.s32.totalorder %s959_s9, %s952_s30 }
  0x58   : > { %p956_p13 = pneg %p955_p8  ;;  %p962_p9 = por %p961_p7, %p960_p3 }
  0x5a   : > { %p963_p12 = pnand %p962_p9, %p956_p13 }
  0x5c   : > { %966 = shalt.err (!%p963_p12)
}
  0x5d   : > { %s1044_s12 = smov 256   ;;  %s1045_s13 = smov 16  }
  0x5e   : > { %804 = dma.hbm_to_vmem [thread:$0]  (!%p1210_p10), %s1206_s8, 512, %s1208_s10, %s1214_s28, %s1044_s12, %s1044_s12, %s1045_s13  }
  0x5f   : > { %p1344_p0 = scmp.ne.s32.totalorder %s1339_s26, 0 }
  0x60   : > { %s1245_s29 = sand.u32 (!%p1344_p0), 1, %s1029_s19   ;;  %p1345_p5 = scmp.ne.s32.totalorder (!%p1344_p0), %s1337_s24, 0 }
  0x61   : > { %232 = sbr.rel (%p1344_p0) target bundleno = 597 (0x255), region = 40  ;;  %s693_s17 = sshll.u32 (!%p1344_p0), %s1245_s29, 5 }
  0x62   : > { %s235_s7 = scalar_lea.sflag (!%p1344_p0), [#allocation3], %s1245_s29  ;;  %s1249_s6 = scalar_lea.vmem (!%p1344_p0), [#allocation2], %s693_s17 }
  0x68   : > { %1012 = dma.done.wait (%p1345_p5), %s235_s7, 512  }
  0x69   : > { %1014 = vsyncadd (%p1345_p5), %s235_s7, 4294966784  ;;  %p1346_p10 = scmp.eq.s32.totalorder %s1102_s22, 0 }
  0x6b   : > { %1016 = dma.done.wait (%p1346_p10), [#allocation6], 3072   ;;  %p1347_p11 = pmov %p1346_p10 }
  0x6c   : > { %v1046_v0 = vmov 0.0   ;;  %v857_v1 = vld [vmem:[#allocation5 + $0x40] sm:$0xff]   ;;  %v859_v3 = vld [vmem:[#allocation5 + $0x48] sm:$0xff]   ;;  %v861_v5 = vld [vmem:[#allocation5 + $0x50] sm:$0xff]   ;;  %vm1047_vm0 = vmmov 0   ;;  %s696_s8 = sshll.u32 %s1245_s29, 4 }
  0x6d   : > { %1018 = vsyncadd (%p1347_p11), [#allocation6], 4294964224  ;;  %762 = vmatprep.subr.bf16.mxu1 %v1046_v0  ;;  %v858_v2 = vld [vmem:[#allocation5] sm:$0xff]   ;;  %731 = vmatprep.subr.bf16.mxu0 %v857_v1  ;;  %v860_v4 = vld [vmem:[#allocation5 + $0x8] sm:$0xff]   ;;  %s272_s28 = scalar_lea.vmem [#allocation8], %s696_s8  ;;  %s730_s15 = sshll.u32 %s1102_s22, 8 }
  0x6e   : > { %732 = vmatpush3.bf16.msra.mxu0 %v858_v2  ;;  %v862_v6 = vld [vmem:[#allocation5 + $0x10] sm:$0xff]   ;;  %v863_v7 = vld [vmem:[#allocation5 + $0x58] sm:$0xff]   ;;  %v865_v9 = vld [vmem:[#allocation5 + $0x60] sm:$0xff]   ;;  %778 = vmatprep.mubr.msk.bf16.mxu1 %vm1047_vm0, %v1046_v0  ;;  %s591_s30 = sshll.u32 %s272_s28, 4  ;;  %s1285_s12 = scalar_lea.hbm %s1333_s5, %s730_s15  ;;  %s1280_s30 = int_to_ptr.vmem [resolvable:$true] %s591_s30 }
  0x6f   : > { %733 = vmatprep.subr.bf16.mxu0 %v859_v3  ;;  %v864_v8 = vld [vmem:[#allocation5 + $0x18] sm:$0xff]   ;;  %v866_v10 = vld [vmem:[#allocation5 + $0x20] sm:$0xff]   ;;  %v867_v11 = vld [vmem:[#allocation5 + $0x68] sm:$0xff]   ;;  %s578_s13 = scalar_lea.sflag [#allocation4], %s1245_s29  ;;  %s967_s17 = scalar_lea.vmem %s1280_s30, 256 }
  0x70   : > { %v277_v12 = vld [vmem:[%s1249_s6 + $0x8] sm:$0xff]  ;;  %v279_v13 = vld [vmem:[%s1249_s6 + $0x18] sm:$0xff]  ;;  %v873_v16 = vld [vmem:[#allocation7] sm:$0xff]   ;;  %p968_p1 = scmp.ne.s32.totalorder %s1280_s30, %s967_s17  ;;  %s1048_s22 = smov [#allocation8]  }
  0x71   : > { %v868_v14 = vld [vmem:[#allocation5 + $0x28] sm:$0xff]   ;;  %v281_v15 = vpack.c.bf16 %v279_v13, %v277_v12  ;;  %v869_v17 = vld [vmem:[#allocation5 + $0x70] sm:$0xff]   ;;  %763 = vmatpush3.bf16.msra.mxu1 %v873_v16  ;;  %v871_v20 = vld [vmem:[#allocation5 + $0x78] sm:$0xff]   ;;  %s971_s7 = sshll.u32 %s1048_s22, 4  ;;  %s972_s7 = int_to_ptr.vmem [resolvable:$false] %s971_s7 }
  0x72   : > { %734 = vmatpush3.bf16.msra.mxu0 %v860_v4  ;;  %v874_v18 = vld [vmem:[#allocation7 + $0x8] sm:$0xff]   ;;  %764 = vmatprep.subr.bf16.mxu1 %v1046_v0  ;;  %v870_v19 = vld [vmem:[#allocation5 + $0x30] sm:$0xff]   ;;  %v872_v22 = vld [vmem:[#allocation5 + $0x38] sm:$0xff]   ;;  %p969_p2 = pnand %p968_p1, %p1193_p4  ;;  %p974_p8 = scmp.lt.s32.totalorder %s1280_s30, %s972_s7 }
  0x73   : > { %735 = vmatprep.subr.bf16.mxu0 %v861_v5  ;;  %449 = vmatprep.mubr.bf16.mxu0 %v281_v15  ;;  %v875_v21 = vld [vmem:[#allocation7 + $0x10] sm:$0xff]   ;;  %v276_v23 = vld [vmem:[%s1249_s6] sm:$0xff]  ;;  %v876_v25 = vld [vmem:[#allocation7 + $0x18] sm:$0xff]  }
  0x74   : > { %v278_v24 = vld [vmem:[%s1249_s6 + $0x10] sm:$0xff]  ;;  %v877_v27 = vld [vmem:[#allocation7 + $0x20] sm:$0xff]   ;;  %v878_v28 = vld [vmem:[#allocation7 + $0x28] sm:$0xff]   ;;  %p970_p6 = pneg %p969_p2  ;;  %s973_s6 = scalar_lea.vmem %s972_s7, 512 }
  0x75   : > { %765 = vmatpush3.bf16.msra.mxu1 %v874_v18  ;;  %v280_v26 = vpack.c.bf16 %v278_v24, %v276_v23  ;;  %v879_v29 = vld [vmem:[#allocation7 + $0x30] sm:$0xff]   ;;  %v880_v30 = vld [vmem:[#allocation7 + $0x38] sm:$0xff]   ;;  %v697_v32 = vld [vmem:[%s1330_s2] ss:$0 sm:$0xff]  ;;  %p975_p13 = scmp.lt.s32.totalorder %s973_s6, %s967_s17 }
  0x76   : > { %736 = vmatpush3.bf16.msra.mxu0 %v862_v6  ;;  %766 = vmatprep.subr.bf16.mxu1 %v1046_v0  ;;  %v714_v43 = vld [vmem:[%s1332_s4] ss:$0 sm:$0xff] }
  0x77   : > { %737 = vmatprep.subr.bf16.mxu0 %v863_v7  ;;  %p976_p3 = por %p975_p13, %p974_p8 }
  0x79   : > { %767 = vmatpush3.bf16.msra.mxu1 %v875_v21  ;;  %p977_p7 = pnand %p976_p3, %p970_p6 }
  0x7a   : > { %738 = vmatpush3.bf16.msra.mxu0 %v864_v8  ;;  %768 = vmatprep.subr.bf16.mxu1 %v1046_v0 }
  0x7b   : > { %739 = vmatprep.subr.bf16.mxu0 %v865_v9 }
  0x7d   : > { %769 = vmatpush3.bf16.msra.mxu1 %v876_v25 }
  0x7e   : > { %740 = vmatpush3.bf16.msra.mxu0 %v866_v10  ;;  %770 = vmatprep.subr.bf16.mxu1 %v1046_v0 }
  0x7f   : > { %741 = vmatprep.subr.bf16.mxu0 %v867_v11 }
  0x81   : > { %771 = vmatpush3.bf16.msra.mxu1 %v877_v27 }
  0x82   : > { %742 = vmatpush3.bf16.msra.mxu0 %v868_v14  ;;  %772 = vmatprep.subr.bf16.mxu1 %v1046_v0 }
  0x83   : > { %743 = vmatprep.subr.bf16.mxu0 %v869_v17 }
  0x85   : > { %773 = vmatpush3.bf16.msra.mxu1 %v878_v28 }
  0x86   : > { %744 = vmatpush3.bf16.msra.mxu0 %v870_v19  ;;  %774 = vmatprep.subr.bf16.mxu1 %v1046_v0 }
  0x87   : > { %745 = vmatprep.subr.bf16.mxu0 %v871_v20 }
  0x89   : > { %775 = vmatpush3.bf16.msra.mxu1 %v879_v29 }
  0x8a   : > { %746 = vmatpush3.bf16.msra.mxu0 %v872_v22  ;;  %776 = vmatprep.subr.bf16.mxu1 %v1046_v0 }
  0x8d   : > { %450 = vmatmul.mubr.bf16.vlgmr.msra.gmra.mrb[0].mxu0 %v280_v26  ;;  %777 = vmatpush3.bf16.msra.mxu1 %v880_v30 }
 0x160   : > { %v747_v31 = vpop.f32.mrb[0].mxu0 }
 0x161   : > { %v748_v33 = vpop.f32.mrb[1].mxu0 }
 0x162   : > { %v749_v34 = vadd.f32 %v748_v33, %v747_v31  ;;  %v750_v35 = vpop.f32.mrb[2].mxu0 }
 0x163   : > { %v751_v36 = vpop.f32.mrb[3].mxu0 }
 0x164   : > { %v452_v37 = vadd.f32 %v749_v34, %v697_v32  ;;  %v752_v38 = vadd.f32 %v751_v36, %v750_v35 }
 0x166   : > { %v455_v39 = vadd.f32 %v752_v38, %v697_v32  ;;  %v458_v40 = vmax.f32 %v452_v37, 0.0 }
 0x168   : > { %v459_v41 = vmax.f32 %v455_v39, 0.0 }
 0x16a   : > { %v460_v42 = vpack.c.bf16 %v459_v41, %v458_v40 }
 0x16c   : > { %779 = vmatmul.mubr.bf16.vlgmr.msra.gmra.mrb[0].mxu1 %v460_v42 }
 0x23f   : > { %v566_v44 = vpop.f32.mrb[0].mxu1 }
 0x240   : > { %v567_v45 = vadd.f32 %v714_v43, %v566_v44  ;;  %v780_v46 = vpop.f32.mrb[1].mxu1 }
 0x241   : > { %v569_v47 = vpop.f32.mrb[2].mxu1 }
 0x242   : > { %v573_v48 = vmax.f32 %v567_v45, 0.0  ;;  %v570_v49 = vadd.f32 %v714_v43, %v569_v47  ;;  %v781_v50 = vpop.f32.mrb[3].mxu1 }
 0x244   : > { %575 = vst [vmem:[%s272_s28] sm:$0xff] %v573_v48  ;;  %v574_v51 = vmax.f32 %v570_v49, 0.0 }
 0x246   : > { %576 = vst [vmem:[%s272_s28 + $0x8] sm:$0xff] %v574_v51 }
 0x247   : > { %980 = shalt.err (!%p977_p7)
}
 0x248   : > { %s981_s24 = scalar_lea.hbm %s1285_s12, 256  ;;  %s985_s10 = scalar_lea.hbm %s1333_s5, 768 }
 0x249   : > { %p982_p9 = scmp.ne.s32.totalorder %s1285_s12, %s981_s24  ;;  %p986_p5 = scmp.lt.u32.totalorder %s1285_s12, %s1333_s5 }
 0x24a   : > { %p987_p10 = scmp.lt.u32.totalorder %s985_s10, %s981_s24  ;;  %p989_p1 = scmp.lt.u32.totalorder %s981_s24, %s1285_s12 }
 0x24b   : > { %p983_p12 = pnand %p982_p9, %p1193_p4 }
 0x24c   : > { %p988_p11 = por %p987_p10, %p986_p5 }
 0x24d   : > { %p984_p0 = pneg %p983_p12 }
 0x24e   : > { %p990_p2 = por %p989_p1, %p988_p11 }
 0x250   : > { %p991_p6 = pnand %p990_p2, %p984_p0 }
 0x252   : > { %994 = shalt.err (!%p991_p6)
}
 0x253   : > { %s1049_s15 = smov 128   ;;  %s1050_s16 = smov 8  }
 0x254   : > { %792 = dma.vmem_to_hbm [thread:$0]  (%p1193_p4), %s1280_s30, 256, %s1285_s12, %s578_s13, %s1049_s15, %s1049_s15, %s1050_s16  }
 0x255 PF: > { %p814_p8 = scmp.ge.s32.totalorder %s1037_s21, 2  ;;  %s606_s9 = sand.u32 1, %s1025_s18  }
 0x256   : > { %p1348_p13 = scmp.ne.s32.totalorder %s1338_s25, 0  ;;  %s607_s17 = scalar_lea.sflag [#allocation4], %s606_s9 }
 0x258   : > { %p806_p3 = pnand %p814_p8, %p1348_p13 }
 0x25a   : > { %1020 = dma.done.wait (!%p806_p3), %s607_s17, 256  }
 0x25b   : > { %1022 = vsyncadd (!%p806_p3), %s607_s17, 4294967040  ;;  %p19_p7 = scmp.ge.s32.totalorder %s1183_s14, 5   ;;  %s1349_s18 = smov %s1029_s19 }
 0x25c   : > { %s1350_s19 = smov %s1033_s20  ;;  %s1351_s20 = smov %s1199_s27 }
 0x25d   : > { %s1352_s21 = smov %s1183_s14  ;;  %21 = sbr.rel (!%p19_p7) target bundleno = 6 (0x6), region = 93 }
 0x264   :  { %612 = vsyncpa [#allocation3], 1 }
 0x265   :  { %614 = vsyncpa [#allocation3 + $0x1], 1 }
 0x266   :  { %615 = vsyncpa [#allocation6], 1 }
 0x267   :  { %616 = vsyncpa [#allocation4], 1 }
 0x268   :  { %618 = vsyncpa [#allocation4 + $0x1], 1 }

</bundles_post_ra>
